<compile_context>
chip_gen: v7x
topology: tpu7x:2x2x1
jax: 0.10.0
libtpu: 0.0.40
codegen_flags: <defaults>
</compile_context>

<pallas_src>
import jax
import jax.numpy as jnp
from jax.experimental import pallas as pl
from jax.experimental.pallas import tpu as pltpu


def _round_up(n, m):
    return ((n + m - 1) // m) * m


def autoencoder_kernel(
    x_ref,
    w1_ref, t1_ref, w2_ref, t2_ref, w3_ref, t3_ref,
    w4_ref, t4_ref, w5_ref, t5_ref, w6_ref, t6_ref,
    out_ref,
):
    h = x_ref[...]                    # already bf16 (cast fused into wrapper pad)

    def layer(h_bf16, w_ref, t_ref):
        # bf16 operands -> native MXU rate; f32 accumulation.
        z = jnp.dot(h_bf16, w_ref[...], preferred_element_type=jnp.float32)
        z = z + t_ref[...]            # Linear bias + BN shift (BN scale folded into W)
        z = jnp.maximum(z, 0.0)       # ReLU in f32 (Dropout is identity in eval mode)
        return z.astype(jnp.bfloat16)

    # ---- encoder ----
    h = layer(h, w1_ref, t1_ref)      # (TB, 256)
    h = layer(h, w2_ref, t2_ref)      # (TB, 128)
    h = layer(h, w3_ref, t3_ref)      # (TB, 64)  = encoded
    # ---- decoder ----
    h = layer(h, w4_ref, t4_ref)      # (TB, 128)
    h = layer(h, w5_ref, t5_ref)      # (TB, 256)

    z = jnp.dot(h, w6_ref[...], preferred_element_type=jnp.float32) + t6_ref[...]
    # f32 sigmoid (EUP), bf16 store -> halves output HBM writeback.
    out_ref[...] = jax.nn.sigmoid(z).astype(out_ref.dtype)


def make_params(key, input_dim):
    """Deterministic PyTorch-style Linear init: U(-1/sqrt(fan_in), 1/sqrt(fan_in))."""
    dims = [(input_dim, 256), (256, 128), (128, 64),
            (64, 128), (128, 256), (256, input_dim)]
    layers = []
    for i, (fin, fout) in enumerate(dims):
        kw, kb = jax.random.split(jax.random.fold_in(key, i))
        bound = 1.0 / (fin ** 0.5)
        w = jax.random.uniform(kw, (fin, fout), jnp.float32, -bound, bound)
        b = jax.random.uniform(kb, (fout,), jnp.float32, -bound, bound)
        layers.append((w, b))
    return layers


def prepare_params(layers, eps=1e-5, lane=128):
    """One-time prep (run once, outside the forward path):
       - fold eval-mode BatchNorm1d (default buffers: mean=0, var=1, gamma=1, beta=0)
         into the weight columns + a shift,
       - zero-pad first-layer rows / last-layer columns to a 128-lane multiple,
       - cast weights to bf16, keep shifts in f32 (shape (1, N) for lane broadcast).
       NOTE: a real checkpoint's running_mean / running_var / gamma / beta must be
       threaded in here instead of the defaults."""
    n = len(layers)
    input_dim = layers[0][0].shape[0]
    in_pad = _round_up(input_dim, lane)
    out_pad = _round_up(layers[-1][0].shape[1], lane)

    prepped = []
    for i, (w, b) in enumerate(layers):
        fout = w.shape[1]
        if i < n - 1:
            gamma = jnp.ones((fout,), jnp.float32)
            beta = jnp.zeros((fout,), jnp.float32)
            mean = jnp.zeros((fout,), jnp.float32)
            var = jnp.ones((fout,), jnp.float32)
            scale = gamma / jnp.sqrt(var + eps)
            w = w * scale[None, :]                 # fold BN scale into W columns
            shift = beta + scale * (b - mean)      # folded Linear bias + BN shift
        else:
            shift = b
        if i == 0:
            w = jnp.pad(w, ((0, in_pad - w.shape[0]), (0, 0)))
        if i == n - 1:
            w = jnp.pad(w, ((0, 0), (0, out_pad - w.shape[1])))
            shift = jnp.pad(shift, (0, out_pad - shift.shape[0]))
        prepped.append((w.astype(jnp.bfloat16),
                        shift.reshape(1, -1).astype(jnp.float32)))
    return prepped


def _choose_batch_tile(B, tile_b):
    """Batch tile: multiple of 16 (bf16 sublane packing). Prefer >=2 grid steps so the
    x/out DMA pipelines and (on v7x) the batch axis can split across both TCs."""
    b16 = _round_up(B, 16)
    if b16 <= 32:                       # tiny batch: a single grid step is unavoidable
        return b16, b16
    tb = min(tile_b, _round_up((b16 + 1) // 2, 16))
    tb = max(tb, 16)
    b_pad = _round_up(B, tb)
    return tb, b_pad


def autoencoder_forward(x, prepped, tile_b=1024, core_parallel=False):
    """Fused eval-mode forward. Returns bf16 (sigmoid output; <0.4% rounding).
    Wrap in jax.jit so the pad + bf16 cast + output slice fuse around the kernel."""
    B, D = x.shape
    in_pad = prepped[0][0].shape[0]      # lane-padded input feature dim
    out_pad = prepped[-1][0].shape[1]    # lane-padded output feature dim

    tb, b_pad = _choose_batch_tile(B, tile_b)

    # bf16 cast first (halves pad traffic), then zero-pad rows/cols; fuses under jit.
    xb = x.astype(jnp.bfloat16)
    if b_pad != B or in_pad != D:
        xb = jnp.pad(xb, ((0, b_pad - B), (0, in_pad - D)))

    flat = []
    for w, t in prepped:
        flat.extend([w, t])

    def whole(a):
        return pl.BlockSpec(a.shape, lambda i: (0,) * a.ndim)  # VMEM-resident across grid

    # "parallel" is safe on every generation; on v7x pass core_parallel=True to force
    # the 2-TensorCore split of the batch axis.
    sem = pltpu.CORE_PARALLEL if core_parallel else "parallel"

    out = pl.pallas_call(
        autoencoder_kernel,
        out_shape=jax.ShapeDtypeStruct((b_pad, out_pad), jnp.bfloat16),
        grid=(b_pad // tb,),
        in_specs=[pl.BlockSpec((tb, in_pad), lambda i: (i, 0))]
                 + [whole(a) for a in flat],
        out_specs=pl.BlockSpec((tb, out_pad), lambda i: (i, 0)),
        compiler_params=pltpu.CompilerParams(dimension_semantics=(sem,)),
    )(xb, *flat)

    return out[:B, :D]


def reference_forward(x, layers, eps=1e-5):
    """Pure-JAX f32 reference with eval-mode BN (default buffers) and eval dropout."""
    h = x
    n = len(layers)
    for i, (w, b) in enumerate(layers):
        z = h @ w + b
        if i < n - 1:
            z = z / jnp.sqrt(1.0 + eps)     # BN eval: mean=0, var=1, gamma=1, beta=0
            h = jnp.maximum(z, 0.0)
        else:
            h = jax.nn.sigmoid(z)
    return h


if __name__ == "__main__":
    key = jax.random.PRNGKey(0)
    B, input_dim = 8, 64

    kx, kp = jax.random.split(key)
    x = jax.random.uniform(kx, (B, input_dim), jnp.float32)
    layers = make_params(kp, input_dim)

    # One-time parameter prep (BN fold, bf16 cast, lane padding) — hoisted out of forward.
    prepped = prepare_params(layers)

    fwd = jax.jit(lambda xx: autoencoder_forward(xx, prepped))
    out = jax.block_until_ready(fwd(x))

    # sanity: shape, sigmoid range, and agreement with the f32 reference
    assert out.shape == (B, input_dim)
    assert bool(jnp.all((out >= 0.0) & (out <= 1.0)))
    ref = reference_forward(x, layers)
    err = jnp.max(jnp.abs(out.astype(jnp.float32) - ref))
    assert bool(err < 3e-2), float(err)   # bf16 weights/activations/output tolerance
    print("KERNEL_OK")
</pallas_src>

<mosaic_0001>
module attributes {stable_mosaic.version = 11 : i64} {
  func.func @autoencoder_kernel(%arg0: i32, %arg1: memref<16x128xbf16, #tpu.memory_space<vmem>>, %arg2: memref<128x256xbf16, #tpu.memory_space<vmem>>, %arg3: memref<1x256xf32, #tpu.memory_space<vmem>>, %arg4: memref<256x128xbf16, #tpu.memory_space<vmem>>, %arg5: memref<1x128xf32, #tpu.memory_space<vmem>>, %arg6: memref<128x64xbf16, #tpu.memory_space<vmem>>, %arg7: memref<1x64xf32, #tpu.memory_space<vmem>>, %arg8: memref<64x128xbf16, #tpu.memory_space<vmem>>, %arg9: memref<1x128xf32, #tpu.memory_space<vmem>>, %arg10: memref<128x256xbf16, #tpu.memory_space<vmem>>, %arg11: memref<1x256xf32, #tpu.memory_space<vmem>>, %arg12: memref<256x128xbf16, #tpu.memory_space<vmem>>, %arg13: memref<1x128xf32, #tpu.memory_space<vmem>>, %arg14: memref<16x128xbf16, #tpu.memory_space<vmem>>) attributes {dimension_semantics = [#tpu.dimension_semantics<parallel>], iteration_bounds = array<i64: 1>, scalar_prefetch = 0 : i64, scratch_operands = 0 : i64, tpu.core_type = #tpu.core_type<tc>, window_params = [{transform_indices = @transform_0, window_bounds = array<i64: 16, 128>}, {pipeline_mode = #tpu.pipeline_mode<synchronous>, transform_indices = @transform_1, window_bounds = array<i64: 128, 256>}, {pipeline_mode = #tpu.pipeline_mode<synchronous>, transform_indices = @transform_2, window_bounds = array<i64: 1, 256>}, {pipeline_mode = #tpu.pipeline_mode<synchronous>, transform_indices = @transform_3, window_bounds = array<i64: 256, 128>}, {pipeline_mode = #tpu.pipeline_mode<synchronous>, transform_indices = @transform_4, window_bounds = array<i64: 1, 128>}, {pipeline_mode = #tpu.pipeline_mode<synchronous>, transform_indices = @transform_5, window_bounds = array<i64: 128, 64>}, {pipeline_mode = #tpu.pipeline_mode<synchronous>, transform_indices = @transform_6, window_bounds = array<i64: 1, 64>}, {pipeline_mode = #tpu.pipeline_mode<synchronous>, transform_indices = @transform_7, window_bounds = array<i64: 64, 128>}, {pipeline_mode = #tpu.pipeline_mode<synchronous>, transform_indices = @transform_8, window_bounds = array<i64: 1, 128>}, {pipeline_mode = #tpu.pipeline_mode<synchronous>, transform_indices = @transform_9, window_bounds = array<i64: 128, 256>}, {pipeline_mode = #tpu.pipeline_mode<synchronous>, transform_indices = @transform_10, window_bounds = array<i64: 1, 256>}, {pipeline_mode = #tpu.pipeline_mode<synchronous>, transform_indices = @transform_11, window_bounds = array<i64: 256, 128>}, {pipeline_mode = #tpu.pipeline_mode<synchronous>, transform_indices = @transform_12, window_bounds = array<i64: 1, 128>}, {transform_indices = @transform_13, window_bounds = array<i64: 16, 128>}]} {
    %c0 = arith.constant 0 : index
    %c0_0 = arith.constant 0 : index
    %0 = vector.load %arg1[%c0, %c0_0] : memref<16x128xbf16, #tpu.memory_space<vmem>>, vector<16x128xbf16>
    %c0_1 = arith.constant 0 : index
    %c0_2 = arith.constant 0 : index
    %1 = vector.load %arg2[%c0_1, %c0_2] : memref<128x256xbf16, #tpu.memory_space<vmem>>, vector<128x256xbf16>
    %cst = arith.constant dense<0.000000e+00> : vector<16x256xf32>
    %2 = tpu.matmul %0, %1, %cst {dimension_numbers = #tpu.dot_dimension_numbers<[1], [0], [0], [1], [0, 0, 1, 1], [], []>} : vector<16x128xbf16>, vector<128x256xbf16>, vector<16x256xf32> -> vector<16x256xf32>
    %c0_3 = arith.constant 0 : index
    %c0_4 = arith.constant 0 : index
    %3 = vector.load %arg3[%c0_3, %c0_4] : memref<1x256xf32, #tpu.memory_space<vmem>>, vector<1x256xf32>
    %4 = vector.broadcast %3 : vector<1x256xf32> to vector<16x256xf32>
    %5 = arith.addf %2, %4 : vector<16x256xf32>
    %cst_5 = arith.constant 0.000000e+00 : f32
    %6 = vector.broadcast %cst_5 : f32 to vector<16x256xf32>
    %7 = arith.maximumf %5, %6 : vector<16x256xf32>
    %8 = arith.truncf %7 : vector<16x256xf32> to vector<16x256xbf16>
    %c0_6 = arith.constant 0 : index
    %c0_7 = arith.constant 0 : index
    %9 = vector.load %arg4[%c0_6, %c0_7] : memref<256x128xbf16, #tpu.memory_space<vmem>>, vector<256x128xbf16>
    %cst_8 = arith.constant dense<0.000000e+00> : vector<16x128xf32>
    %10 = tpu.matmul %8, %9, %cst_8 {dimension_numbers = #tpu.dot_dimension_numbers<[1], [0], [0], [1], [0, 0, 1, 1], [], []>} : vector<16x256xbf16>, vector<256x128xbf16>, vector<16x128xf32> -> vector<16x128xf32>
    %c0_9 = arith.constant 0 : index
    %c0_10 = arith.constant 0 : index
    %11 = vector.load %arg5[%c0_9, %c0_10] : memref<1x128xf32, #tpu.memory_space<vmem>>, vector<1x128xf32>
    %12 = vector.broadcast %11 : vector<1x128xf32> to vector<16x128xf32>
    %13 = arith.addf %10, %12 : vector<16x128xf32>
    %cst_11 = arith.constant 0.000000e+00 : f32
    %14 = vector.broadcast %cst_11 : f32 to vector<16x128xf32>
    %15 = arith.maximumf %13, %14 : vector<16x128xf32>
    %16 = arith.truncf %15 : vector<16x128xf32> to vector<16x128xbf16>
    %c0_12 = arith.constant 0 : index
    %c0_13 = arith.constant 0 : index
    %17 = vector.load %arg6[%c0_12, %c0_13] : memref<128x64xbf16, #tpu.memory_space<vmem>>, vector<128x64xbf16>
    %cst_14 = arith.constant dense<0.000000e+00> : vector<16x64xf32>
    %18 = tpu.matmul %16, %17, %cst_14 {dimension_numbers = #tpu.dot_dimension_numbers<[1], [0], [0], [1], [0, 0, 1, 1], [], []>} : vector<16x128xbf16>, vector<128x64xbf16>, vector<16x64xf32> -> vector<16x64xf32>
    %c0_15 = arith.constant 0 : index
    %c0_16 = arith.constant 0 : index
    %19 = vector.load %arg7[%c0_15, %c0_16] : memref<1x64xf32, #tpu.memory_space<vmem>>, vector<1x64xf32>
    %20 = vector.broadcast %19 : vector<1x64xf32> to vector<16x64xf32>
    %21 = arith.addf %18, %20 : vector<16x64xf32>
    %cst_17 = arith.constant 0.000000e+00 : f32
    %22 = vector.broadcast %cst_17 : f32 to vector<16x64xf32>
    %23 = arith.maximumf %21, %22 : vector<16x64xf32>
    %24 = arith.truncf %23 : vector<16x64xf32> to vector<16x64xbf16>
    %c0_18 = arith.constant 0 : index
    %c0_19 = arith.constant 0 : index
    %25 = vector.load %arg8[%c0_18, %c0_19] : memref<64x128xbf16, #tpu.memory_space<vmem>>, vector<64x128xbf16>
    %cst_20 = arith.constant dense<0.000000e+00> : vector<16x128xf32>
    %26 = tpu.matmul %24, %25, %cst_20 {dimension_numbers = #tpu.dot_dimension_numbers<[1], [0], [0], [1], [0, 0, 1, 1], [], []>} : vector<16x64xbf16>, vector<64x128xbf16>, vector<16x128xf32> -> vector<16x128xf32>
    %c0_21 = arith.constant 0 : index
    %c0_22 = arith.constant 0 : index
    %27 = vector.load %arg9[%c0_21, %c0_22] : memref<1x128xf32, #tpu.memory_space<vmem>>, vector<1x128xf32>
    %28 = vector.broadcast %27 : vector<1x128xf32> to vector<16x128xf32>
    %29 = arith.addf %26, %28 : vector<16x128xf32>
    %cst_23 = arith.constant 0.000000e+00 : f32
    %30 = vector.broadcast %cst_23 : f32 to vector<16x128xf32>
    %31 = arith.maximumf %29, %30 : vector<16x128xf32>
    %32 = arith.truncf %31 : vector<16x128xf32> to vector<16x128xbf16>
    %c0_24 = arith.constant 0 : index
    %c0_25 = arith.constant 0 : index
    %33 = vector.load %arg10[%c0_24, %c0_25] : memref<128x256xbf16, #tpu.memory_space<vmem>>, vector<128x256xbf16>
    %cst_26 = arith.constant dense<0.000000e+00> : vector<16x256xf32>
    %34 = tpu.matmul %32, %33, %cst_26 {dimension_numbers = #tpu.dot_dimension_numbers<[1], [0], [0], [1], [0, 0, 1, 1], [], []>} : vector<16x128xbf16>, vector<128x256xbf16>, vector<16x256xf32> -> vector<16x256xf32>
    %c0_27 = arith.constant 0 : index
    %c0_28 = arith.constant 0 : index
    %35 = vector.load %arg11[%c0_27, %c0_28] : memref<1x256xf32, #tpu.memory_space<vmem>>, vector<1x256xf32>
    %36 = vector.broadcast %35 : vector<1x256xf32> to vector<16x256xf32>
    %37 = arith.addf %34, %36 : vector<16x256xf32>
    %cst_29 = arith.constant 0.000000e+00 : f32
    %38 = vector.broadcast %cst_29 : f32 to vector<16x256xf32>
    %39 = arith.maximumf %37, %38 : vector<16x256xf32>
    %40 = arith.truncf %39 : vector<16x256xf32> to vector<16x256xbf16>
    %c0_30 = arith.constant 0 : index
    %c0_31 = arith.constant 0 : index
    %41 = vector.load %arg12[%c0_30, %c0_31] : memref<256x128xbf16, #tpu.memory_space<vmem>>, vector<256x128xbf16>
    %cst_32 = arith.constant dense<0.000000e+00> : vector<16x128xf32>
    %42 = tpu.matmul %40, %41, %cst_32 {dimension_numbers = #tpu.dot_dimension_numbers<[1], [0], [0], [1], [0, 0, 1, 1], [], []>} : vector<16x256xbf16>, vector<256x128xbf16>, vector<16x128xf32> -> vector<16x128xf32>
    %c0_33 = arith.constant 0 : index
    %c0_34 = arith.constant 0 : index
    %43 = vector.load %arg13[%c0_33, %c0_34] : memref<1x128xf32, #tpu.memory_space<vmem>>, vector<1x128xf32>
    %44 = vector.broadcast %43 : vector<1x128xf32> to vector<16x128xf32>
    %45 = arith.addf %42, %44 : vector<16x128xf32>
    %46 = arith.negf %45 : vector<16x128xf32>
    %47 = math.exp %46 : vector<16x128xf32>
    %cst_35 = arith.constant 1.000000e+00 : f32
    %48 = vector.broadcast %cst_35 : f32 to vector<16x128xf32>
    %49 = arith.addf %48, %47 : vector<16x128xf32>
    %50 = arith.divf %48, %49 : vector<16x128xf32>
    %51 = arith.truncf %50 : vector<16x128xf32> to vector<16x128xbf16>
    %c0_36 = arith.constant 0 : index
    %c0_37 = arith.constant 0 : index
    %52 = vector.load %arg14[%c0_36, %c0_37] : memref<16x128xbf16, #tpu.memory_space<vmem>>, vector<16x128xbf16>
    tpu.vector_store %arg14[%c0_36, %c0_37], %51 {strides = array<i32>} : memref<16x128xbf16, #tpu.memory_space<vmem>>, vector<16x128xbf16>,
    return
  }
  func.func @transform_0(%arg0: i32) -> (i32, i32) {
    %c0_i32 = arith.constant 0 : i32
    %c0_i32_0 = arith.constant 0 : i32
    return %arg0, %c0_i32 : i32, i32
  }
  func.func @transform_1(%arg0: i32) -> (i32, i32) {
    %c0_i32 = arith.constant 0 : i32
    %c0_i32_0 = arith.constant 0 : i32
    %c0_i32_1 = arith.constant 0 : i32
    return %c0_i32, %c0_i32_0 : i32, i32
  }
  func.func @transform_2(%arg0: i32) -> (i32, i32) {
    %c0_i32 = arith.constant 0 : i32
    %c0_i32_0 = arith.constant 0 : i32
    %c0_i32_1 = arith.constant 0 : i32
    return %c0_i32, %c0_i32_0 : i32, i32
  }
  func.func @transform_3(%arg0: i32) -> (i32, i32) {
    %c0_i32 = arith.constant 0 : i32
    %c0_i32_0 = arith.constant 0 : i32
    %c0_i32_1 = arith.constant 0 : i32
    return %c0_i32, %c0_i32_0 : i32, i32
  }
  func.func @transform_4(%arg0: i32) -> (i32, i32) {
    %c0_i32 = arith.constant 0 : i32
    %c0_i32_0 = arith.constant 0 : i32
    %c0_i32_1 = arith.constant 0 : i32
    return %c0_i32, %c0_i32_0 : i32, i32
  }
  func.func @transform_5(%arg0: i32) -> (i32, i32) {
    %c0_i32 = arith.constant 0 : i32
    %c0_i32_0 = arith.constant 0 : i32
    %c0_i32_1 = arith.constant 0 : i32
    return %c0_i32, %c0_i32_0 : i32, i32
  }
  func.func @transform_6(%arg0: i32) -> (i32, i32) {
    %c0_i32 = arith.constant 0 : i32
    %c0_i32_0 = arith.constant 0 : i32
    %c0_i32_1 = arith.constant 0 : i32
    return %c0_i32, %c0_i32_0 : i32, i32
  }
  func.func @transform_7(%arg0: i32) -> (i32, i32) {
    %c0_i32 = arith.constant 0 : i32
    %c0_i32_0 = arith.constant 0 : i32
    %c0_i32_1 = arith.constant 0 : i32
    return %c0_i32, %c0_i32_0 : i32, i32
  }
  func.func @transform_8(%arg0: i32) -> (i32, i32) {
    %c0_i32 = arith.constant 0 : i32
    %c0_i32_0 = arith.constant 0 : i32
    %c0_i32_1 = arith.constant 0 : i32
    return %c0_i32, %c0_i32_0 : i32, i32
  }
  func.func @transform_9(%arg0: i32) -> (i32, i32) {
    %c0_i32 = arith.constant 0 : i32
    %c0_i32_0 = arith.constant 0 : i32
    %c0_i32_1 = arith.constant 0 : i32
    return %c0_i32, %c0_i32_0 : i32, i32
  }
  func.func @transform_10(%arg0: i32) -> (i32, i32) {
    %c0_i32 = arith.constant 0 : i32
    %c0_i32_0 = arith.constant 0 : i32
    %c0_i32_1 = arith.constant 0 : i32
    return %c0_i32, %c0_i32_0 : i32, i32
  }
  func.func @transform_11(%arg0: i32) -> (i32, i32) {
    %c0_i32 = arith.constant 0 : i32
    %c0_i32_0 = arith.constant 0 : i32
    %c0_i32_1 = arith.constant 0 : i32
    return %c0_i32, %c0_i32_0 : i32, i32
  }
  func.func @transform_12(%arg0: i32) -> (i32, i32) {
    %c0_i32 = arith.constant 0 : i32
    %c0_i32_0 = arith.constant 0 : i32
    %c0_i32_1 = arith.constant 0 : i32
    return %c0_i32, %c0_i32_0 : i32, i32
  }
  func.func @transform_13(%arg0: i32) -> (i32, i32) {
    %c0_i32 = arith.constant 0 : i32
    %c0_i32_0 = arith.constant 0 : i32
    return %arg0, %c0_i32 : i32, i32
  }
}

</mosaic_0001>

<bundles_post_ra>
// kernel: _lambda_.1
= control target key start
LH: loop header
LB: loop body
LE: loop exit
PB: predicated region body
PF: predicated region fallthrough
CT: control target
= control target key end

     0   :  { %v1237_v1 = vmov 0   ;;  %v1238_v34 = vmov 0.0   ;;  %v65_v40 = vlaneseq  ;;  %vm1239_vm0 = vmmov 0   ;;  %s1590_s1 = inlined_call_operand.vmem [shape: bf16[128,256], index: 1, kind: input, shape index: {}]   ;;  %s1591_s0 = inlined_call_operand.vmem [shape: bf16[16,128], index: 0, kind: input, shape index: {}]   ;;  %s1592_s3 = inlined_call_operand.vmem [shape: bf16[256,128], index: 3, kind: input, shape index: {}]   ;;  %s1593_s5 = inlined_call_operand.vmem [shape: bf16[128,64], index: 5, kind: input, shape index: {}]   ;;  %s1594_s2 = inlined_call_operand.vmem [shape: f32[1,256], index: 2, kind: input, shape index: {}]   ;;  %s1595_s7 = inlined_call_operand.vmem [shape: bf16[64,128], index: 7, kind: input, shape index: {}]   ;;  %s1596_s4 = inlined_call_operand.vmem [shape: f32[1,128], index: 4, kind: input, shape index: {}]   ;;  %s1597_s9 = inlined_call_operand.vmem [shape: bf16[128,256], index: 9, kind: input, shape index: {}]   ;;  %s1598_s6 = inlined_call_operand.vmem [shape: f32[1,64], index: 6, kind: input, shape index: {}]   ;;  %s1599_s11 = inlined_call_operand.vmem [shape: bf16[256,128], index: 11, kind: input, shape index: {}]   ;;  %s1600_s8 = inlined_call_operand.vmem [shape: f32[1,128], index: 8, kind: input, shape index: {}]   ;;  %s1601_s10 = inlined_call_operand.vmem [shape: f32[1,256], index: 10, kind: input, shape index: {}]   ;;  %s1602_s12 = inlined_call_operand.vmem [shape: f32[1,128], index: 12, kind: input, shape index: {}]   ;;  %s1603_s13 = inlined_call_operand.vmem [shape: bf16[16,128], index: 13, kind: output, shape index: {}]  }
   0x1   :  { %v1136_v0 = vld [vmem:[%s1590_s1 + $0x4] ss:$8 sps:$4 sm:$0xff]   ;;  %193 = vmatprep.mubr.bf16.mxu0 %v1237_v1  ;;  %v1138_v2 = vld [vmem:[%s1590_s1] ss:$8 sps:$4 sm:$0xff]   ;;  %v1139_v3 = vld [vmem:[%s1590_s1 + $0x14] ss:$8 sps:$4 sm:$0xff]  }
   0x2   :  { %161 = vmatprep.subr.bf16.mxu0 %v1136_v0  ;;  %v1141_v4 = vld [vmem:[%s1590_s1 + $0x10] ss:$8 sps:$4 sm:$0xff]   ;;  %v1142_v5 = vld [vmem:[%s1590_s1 + $0x24] ss:$8 sps:$4 sm:$0xff]   ;;  %v1144_v6 = vld [vmem:[%s1590_s1 + $0x20] ss:$8 sps:$4 sm:$0xff]  }
   0x3   :  { %162 = vmatpush1.bf16.msra.mxu0 %v1138_v2  ;;  %v1145_v7 = vld [vmem:[%s1590_s1 + $0x34] ss:$8 sps:$4 sm:$0xff]   ;;  %v1147_v8 = vld [vmem:[%s1590_s1 + $0x30] ss:$8 sps:$4 sm:$0xff]   ;;  %v1148_v9 = vld [vmem:[%s1590_s1 + $0x44] ss:$8 sps:$4 sm:$0xff]  }
   0x4   :  { %163 = vmatprep.subr.bf16.mxu0 %v1139_v3  ;;  %v1161_v10 = vld [vmem:[%s1592_s3 + $0x40] sm:$0xff]   ;;  %v1151_v13 = vld [vmem:[%s1590_s1 + $0x54] ss:$8 sps:$4 sm:$0xff]   ;;  %v1163_v14 = vld [vmem:[%s1592_s3 + $0x48] sm:$0xff]   ;;  %v1432_v41 = vshrl.u32 %v65_v40, 7  ;;  %vm543_vm1 = vcmask 523264  }
   0x5   :  { %v1150_v11 = vld [vmem:[%s1590_s1 + $0x40] ss:$8 sps:$4 sm:$0xff]   ;;  %1043 = vmatprep.subr.bf16.mxu1 %v1161_v10  ;;  %v1165_v16 = vld [vmem:[%s1592_s3 + $0x50] sm:$0xff]   ;;  %v1154_v18 = vld [vmem:[%s1590_s1 + $0x64] ss:$8 sps:$4 sm:$0xff]  }
   0x6   :  { %v1162_v12 = vld [vmem:[%s1592_s3] sm:$0xff]   ;;  %v1164_v15 = vld [vmem:[%s1592_s3 + $0x8] sm:$0xff]   ;;  %v1153_v17 = vld [vmem:[%s1590_s1 + $0x50] ss:$8 sps:$4 sm:$0xff]   ;;  %v67_v42 = vsub.s32 0, %v1432_v41  ;;  %v71_v44 = vsub.s32 1, %v1432_v41 }
   0x7   :  { %164 = vmatpush1.bf16.msra.mxu0 %v1141_v4  ;;  %1044 = vmatpush3.bf16.msra.mxu1 %v1162_v12  ;;  %v1166_v19 = vld [vmem:[%s1592_s3 + $0x10] sm:$0xff]   ;;  %v1167_v20 = vld [vmem:[%s1592_s3 + $0x58] sm:$0xff]   ;;  %v1156_v21 = vld [vmem:[%s1590_s1 + $0x60] ss:$8 sps:$4 sm:$0xff]  }
   0x8   :  { %165 = vmatprep.subr.bf16.mxu0 %v1142_v5  ;;  %1045 = vmatprep.subr.bf16.mxu1 %v1163_v14  ;;  %v1157_v22 = vld [vmem:[%s1590_s1 + $0x74] ss:$8 sps:$4 sm:$0xff]   ;;  %v1169_v24 = vld [vmem:[%s1592_s3 + $0x60] sm:$0xff]   ;;  %v1159_v25 = vld [vmem:[%s1590_s1 + $0x70] ss:$8 sps:$4 sm:$0xff]  }
   0x9   :  { %v1168_v23 = vld [vmem:[%s1592_s3 + $0x18] sm:$0xff]   ;;  %v1170_v26 = vld [vmem:[%s1592_s3 + $0x20] sm:$0xff]   ;;  %v1171_v27 = vld [vmem:[%s1592_s3 + $0x68] sm:$0xff]  }
   0xa   :  { %v1160_v28 = vld [vmem:[%s1591_s0] sm:$0xff]   ;;  %v1172_v29 = vld [vmem:[%s1592_s3 + $0x28] sm:$0xff]   ;;  %v1173_v30 = vld [vmem:[%s1592_s3 + $0x70] sm:$0xff]  }
   0xb   :  { %166 = vmatpush1.bf16.msra.mxu0 %v1144_v6  ;;  %1046 = vmatpush3.bf16.msra.mxu1 %v1164_v15  ;;  %v1174_v31 = vld [vmem:[%s1592_s3 + $0x30] sm:$0xff]   ;;  %v1175_v32 = vld [vmem:[%s1592_s3 + $0x78] sm:$0xff]   ;;  %v1177_v35 = vld [vmem:[%s1593_s5] sm:$0xff]  }
   0xc   :  { %167 = vmatprep.subr.bf16.mxu0 %v1145_v7  ;;  %1047 = vmatprep.subr.bf16.mxu1 %v1165_v16  ;;  %v1176_v33 = vld [vmem:[%s1592_s3 + $0x38] sm:$0xff]   ;;  %v1178_v36 = vld [vmem:[%s1593_s5 + $0x8] sm:$0xff]   ;;  %v1179_v37 = vld [vmem:[%s1593_s5 + $0x10] sm:$0xff]  }
   0xd   :  { %v1180_v38 = vld [vmem:[%s1593_s5 + $0x18] sm:$0xff]   ;;  %v1181_v39 = vld [vmem:[%s1593_s5 + $0x20] sm:$0xff]   ;;  %v1182_v61 = vld [vmem:[%s1593_s5 + $0x28] sm:$0xff]  }
   0xe   :  { %v63_v43 = vld [vmem:[%s1594_s2] sm:$0x3]  ;;  %v1183_v62 = vld [vmem:[%s1593_s5 + $0x30] sm:$0xff]   ;;  %v1184_v63 = vld [vmem:[%s1593_s5 + $0x38] sm:$0xff]  }
   0xf   :  { %168 = vmatpush1.bf16.msra.mxu0 %v1147_v8  ;;  %1048 = vmatpush3.bf16.msra.mxu1 %v1166_v19  ;;  %v68_v45 = vrot.slane %v63_v43, %v67_v42  ;;  %v72_v46 = vrot.slane %v63_v43, %v71_v44  ;;  %v1185_v0 = vld [vmem:[%s1595_s7] sm:$0xff]   ;;  %v1186_v2 = vld [vmem:[%s1595_s7 + $0x8] sm:$0xff]   ;;  %v1187_v15 = vld [vmem:[%s1595_s7 + $0x10] sm:$0xff]  }
  0x10   :  { %169 = vmatprep.subr.bf16.mxu0 %v1148_v9  ;;  %1049 = vmatprep.subr.bf16.mxu1 %v1167_v20  ;;  %v967_v4 = vld [vmem:[%s1596_s4] ss:$0 sm:$0xff]  ;;  %v1188_v16 = vld [vmem:[%s1595_s7 + $0x18] sm:$0xff]  }
  0x11   :  { %v1212_v40 = vld [vmem:[%s1597_s9 + $0x74] ss:$8 sps:$4 sm:$0xff]   ;;  %v1210_v43 = vld [vmem:[%s1597_s9 + $0x70] ss:$8 sps:$4 sm:$0xff]   ;;  %v1015_v41 = vld [vmem:[%s1602_s12] ss:$0 sm:$0xff] }
  0x13   :  { %170 = vmatpush1.bf16.msra.mxu0 %v1150_v11  ;;  %1050 = vmatpush3.bf16.msra.mxu1 %v1168_v23 }
  0x14   :  { %171 = vmatprep.subr.bf16.mxu0 %v1151_v13  ;;  %1051 = vmatprep.subr.bf16.mxu1 %v1169_v24 }
  0x17   :  { %172 = vmatpush1.bf16.msra.mxu0 %v1153_v17  ;;  %1052 = vmatpush3.bf16.msra.mxu1 %v1170_v26  ;;  %v1191_v17 = vld [vmem:[%s1597_s9 + $0x4] ss:$8 sps:$4 sm:$0xff]  }
  0x18   :  { %173 = vmatprep.subr.bf16.mxu0 %v1154_v18  ;;  %1053 = vmatprep.subr.bf16.mxu1 %v1171_v27  ;;  %v984_v18 = vld [vmem:[%s1598_s6] ss:$0 sm:$0xff] }
  0x19   :  { %v1189_v27 = vld [vmem:[%s1597_s9] ss:$8 sps:$4 sm:$0xff]  }
  0x1b   :  { %174 = vmatpush1.bf16.msra.mxu0 %v1156_v21  ;;  %1054 = vmatpush3.bf16.msra.mxu1 %v1172_v29  ;;  %v1194_v29 = vld [vmem:[%s1597_s9 + $0x14] ss:$8 sps:$4 sm:$0xff]  }
  0x1c   :  { %175 = vmatprep.subr.bf16.mxu0 %v1157_v22  ;;  %1055 = vmatprep.subr.bf16.mxu1 %v1173_v30  ;;  %v1192_v30 = vld [vmem:[%s1597_s9 + $0x10] ss:$8 sps:$4 sm:$0xff]  }
  0x1f   :  { %176 = vmatpush1.bf16.msra.mxu0 %v1159_v25  ;;  %1056 = vmatpush3.bf16.msra.mxu1 %v1174_v31  ;;  %v1197_v31 = vld [vmem:[%s1597_s9 + $0x24] ss:$8 sps:$4 sm:$0xff]  }
  0x20   :  { %1057 = vmatprep.subr.bf16.mxu1 %v1175_v32  ;;  %1101 = vmatprep.subr.bf16.mxu0 %v1238_v34  ;;  %v1195_v32 = vld [vmem:[%s1597_s9 + $0x20] ss:$8 sps:$4 sm:$0xff]  }
  0x22   :  { %194 = vmatmul.mubr.bf16.vlgmr.msra.gmra.mrb[0].mxu0 %v1160_v28 }
  0x23   :  { %1058 = vmatpush3.bf16.msra.mxu1 %v1176_v33  ;;  %1102 = vmatpush3.bf16.msra.mxu0 %v1177_v35  ;;  %v1200_v33 = vld [vmem:[%s1597_s9 + $0x34] ss:$8 sps:$4 sm:$0xff]   ;;  %v1201_v35 = vld [vmem:[%s1597_s9 + $0x40] ss:$8 sps:$4 sm:$0xff]  }
  0x24   :  { %1121 = vmatprep.subr.bf16.mxu1 %v1238_v34  ;;  %1103 = vmatprep.subr.bf16.mxu0 %v1238_v34 }
  0x25   :  { %1117 = vmatprep.mubr.msk.bf16.mxu0 %vm1239_vm0, %v1238_v34 }
  0x27   :  { %1104 = vmatpush3.bf16.msra.mxu0 %v1178_v36  ;;  %v1206_v36 = vld [vmem:[%s1597_s9 + $0x54] ss:$8 sps:$4 sm:$0xff]  }
  0x28   :  { %1105 = vmatprep.subr.bf16.mxu0 %v1238_v34 }
  0x2b   :  { %1106 = vmatpush3.bf16.msra.mxu0 %v1179_v37  ;;  %v1204_v37 = vld [vmem:[%s1597_s9 + $0x50] ss:$8 sps:$4 sm:$0xff]  }
  0x2c   :  { %1107 = vmatprep.subr.bf16.mxu0 %v1238_v34 }
  0x2f   :  { %1108 = vmatpush3.bf16.msra.mxu0 %v1180_v38  ;;  %v1209_v38 = vld [vmem:[%s1597_s9 + $0x64] ss:$8 sps:$4 sm:$0xff]  }
  0x30   :  { %1109 = vmatprep.subr.bf16.mxu0 %v1238_v34 }
  0x33   :  { %1110 = vmatpush3.bf16.msra.mxu0 %v1181_v39  ;;  %v1207_v39 = vld [vmem:[%s1597_s9 + $0x60] ss:$8 sps:$4 sm:$0xff]  }
  0x34   :  { %1111 = vmatprep.subr.bf16.mxu0 %v1238_v34 }
  0x37   :  { %1112 = vmatpush3.bf16.msra.mxu0 %v1182_v61 }
  0x38   :  { %1113 = vmatprep.subr.bf16.mxu0 %v1238_v34 }
  0x3b   :  { %1114 = vmatpush3.bf16.msra.mxu0 %v1183_v62 }
  0x3c   :  { %1115 = vmatprep.subr.bf16.mxu0 %v1238_v34 }
  0x3f   :  { %1116 = vmatpush3.bf16.msra.mxu0 %v1184_v63 }
  0xf5   :  { %v195_v47 = vpop.f32.mrb[0].mxu0 }
  0xf6   :  { %v196_v48 = vadd.f32 %v195_v47, %v68_v45  ;;  %v197_v49 = vpop.f32.mrb[1].mxu0  ;;  %v1215_v47 = vld [vmem:[%s1599_s11 + $0x48] sm:$0xff]  }
  0xf7   :  { %v198_v50 = vadd.f32 %v197_v49, %v72_v46  ;;  %v199_v51 = vpop.f32.mrb[2].mxu0  ;;  %v1217_v49 = vld [vmem:[%s1599_s11 + $0x50] sm:$0xff]  }
  0xf8   :  { %v200_v52 = vadd.f32 %v199_v51, %v68_v45  ;;  %v201_v53 = vpop.f32.mrb[3].mxu0  ;;  %v204_v55 = vmax.f32 %v196_v48, 0.0  ;;  %v1213_v45 = vld [vmem:[%s1599_s11 + $0x40] sm:$0xff]   ;;  %v1216_v48 = vld [vmem:[%s1599_s11 + $0x8] sm:$0xff]   ;;  %v1219_v51 = vld [vmem:[%s1599_s11 + $0x58] sm:$0xff]  }
  0xf9   :  { %v202_v54 = vadd.f32 %v201_v53, %v72_v46  ;;  %v205_v57 = vmax.f32 %v198_v50, 0.0  ;;  %v1214_v46 = vld [vmem:[%s1599_s11] sm:$0xff]   ;;  %1079 = vmatprep.subr.bf16.mxu0 %v1213_v45  ;;  %v1218_v50 = vld [vmem:[%s1599_s11 + $0x10] sm:$0xff]  }
  0xfa   :  { %v206_v56 = vmax.f32 %v200_v52, 0.0  ;;  %v1220_v52 = vld [vmem:[%s1599_s11 + $0x18] sm:$0xff]   ;;  %v1221_v53 = vld [vmem:[%s1599_s11 + $0x60] sm:$0xff]  }
  0xfb   :  { %v207_v58 = vmax.f32 %v202_v54, 0.0  ;;  %v1222_v54 = vld [vmem:[%s1599_s11 + $0x20] sm:$0xff]  }
  0xfc   :  { %v208_v59 = vpack.c.bf16 %v206_v56, %v204_v55  ;;  %v1223_v55 = vld [vmem:[%s1599_s11 + $0x68] sm:$0xff]   ;;  %v993_v56 = vld [vmem:[%s1600_s8] ss:$0 sm:$0xff] }
  0xfd   :  { %v209_v60 = vpack.c.bf16 %v207_v58, %v205_v57 }
  0xff   :  { %377 = vmatprep.mubr.bf16.mxu1 %v209_v60 }
 0x100   :  { %378 = vmatmul.mubr.bf16.vlgmr.msra.gmra.mrb[0].mxu1 %v208_v59 }
 0x101   :  { %1129 = vmatprep.mubr.msk.bf16.mxu1 %vm1239_vm0, %v1238_v34  ;;  %1122 = vmatpush3.bf16.msra.mxu1 %v1185_v0 }
 0x102   :  { %1123 = vmatprep.subr.bf16.mxu1 %v1238_v34 }
 0x105   :  { %1124 = vmatpush3.bf16.msra.mxu1 %v1186_v2 }
 0x106   :  { %1125 = vmatprep.subr.bf16.mxu1 %v1238_v34 }
 0x109   :  { %1126 = vmatpush3.bf16.msra.mxu1 %v1187_v15 }
 0x10a   :  { %1127 = vmatprep.subr.bf16.mxu1 %v1238_v34  ;;  %v1203_v34 = vld [vmem:[%s1597_s9 + $0x44] ss:$8 sps:$4 sm:$0xff]  }
 0x10d   :  { %1128 = vmatpush3.bf16.msra.mxu1 %v1188_v16 }
 0x10e   :  { %699 = vmatprep.subr.bf16.mxu1 %v1191_v17 }
 0x1d3   :  { %v1059_v3 = vpop.f32.mrb[0].mxu1 }
 0x1d4   :  { %v1060_v5 = vpop.f32.mrb[1].mxu1 }
 0x1d5   :  { %v1061_v6 = vadd.f32 %v1060_v5, %v1059_v3  ;;  %v1062_v7 = vpop.f32.mrb[2].mxu1  ;;  %v1224_v3 = vld [vmem:[%s1599_s11 + $0x28] sm:$0xff]   ;;  %v1226_v5 = vld [vmem:[%s1599_s11 + $0x30] sm:$0xff]  }
 0x1d6   :  { %v1063_v8 = vpop.f32.mrb[3].mxu1 }
 0x1d7   :  { %v380_v9 = vadd.f32 %v1061_v6, %v967_v4  ;;  %v1064_v10 = vadd.f32 %v1063_v8, %v1062_v7  ;;  %v1227_v6 = vld [vmem:[%s1599_s11 + $0x78] sm:$0xff]   ;;  %v607_v8 = vld [vmem:[%s1601_s10] sm:$0x3] }
 0x1d8   :  { %v1228_v7 = vld [vmem:[%s1599_s11 + $0x38] sm:$0xff]  }
 0x1d9   :  { %v383_v11 = vadd.f32 %v1064_v10, %v967_v4  ;;  %v386_v12 = vmax.f32 %v380_v9, 0.0  ;;  %v1225_v4 = vld [vmem:[%s1599_s11 + $0x70] sm:$0xff]   ;;  %v612_v9 = vrot.slane %v607_v8, %v67_v42  ;;  %v616_v10 = vrot.slane %v607_v8, %v71_v44 }
 0x1db   :  { %v387_v13 = vmax.f32 %v383_v11, 0.0 }
 0x1dd   :  { %v388_v14 = vpack.c.bf16 %v387_v13, %v386_v12 }
 0x1df   :  { %1118 = vmatmul.mubr.bf16.vlgmr.msra.gmra.mrb[4].mxu0 %v388_v14 }
 0x1e0   :  { %1080 = vmatpush3.bf16.msra.mxu0 %v1214_v46 }
 0x1e1   :  { %1081 = vmatprep.subr.bf16.mxu0 %v1215_v47 }
 0x1e4   :  { %1082 = vmatpush3.bf16.msra.mxu0 %v1216_v48 }
 0x1e5   :  { %1083 = vmatprep.subr.bf16.mxu0 %v1217_v49 }
 0x1e8   :  { %1084 = vmatpush3.bf16.msra.mxu0 %v1218_v50 }
 0x1e9   :  { %1085 = vmatprep.subr.bf16.mxu0 %v1219_v51 }
 0x1ec   :  { %1086 = vmatpush3.bf16.msra.mxu0 %v1220_v52 }
 0x1ed   :  { %1087 = vmatprep.subr.bf16.mxu0 %v1221_v53 }
 0x1f0   :  { %1088 = vmatpush3.bf16.msra.mxu0 %v1222_v54 }
 0x1f1   :  { %1089 = vmatprep.subr.bf16.mxu0 %v1223_v55 }
 0x1f4   :  { %1090 = vmatpush3.bf16.msra.mxu0 %v1224_v3 }
 0x1f5   :  { %1091 = vmatprep.subr.bf16.mxu0 %v1225_v4 }
 0x1f8   :  { %1092 = vmatpush3.bf16.msra.mxu0 %v1226_v5 }
 0x1f9   :  { %1093 = vmatprep.subr.bf16.mxu0 %v1227_v6 }
 0x1fc   :  { %1094 = vmatpush3.bf16.msra.mxu0 %v1228_v7 }
 0x2b2   :  { %v494_v19 = vpop.f32.mrb[4].mxu0 }
 0x2b3   :  { %v495_v20 = vadd.f32 %v984_v18, %v494_v19  ;;  %v1119_v21 = vpop.f32.mrb[5].mxu0 }
 0x2b4   :  { %v497_v22 = vpop.f32.mrb[6].mxu0 }
 0x2b5   :  { %v498_v23 = vadd.f32 %v984_v18, %v497_v22  ;;  %v1120_v24 = vpop.f32.mrb[7].mxu0  ;;  %v501_v25 = vmax.f32 %v495_v20, 0.0 }
 0x2b7   :  { %v502_v26 = vmax.f32 %v498_v23, 0.0 }
 0x2b9   :  { %v503_v28 = vpack.c.bf16 %v502_v26, %v501_v25 }
 0x2bb   :  { %1130 = vmatmul.mubr.msk.bf16.vlgmr.msra.gmra.mrb[4].mxu1 %vm543_vm1, %v503_v28 }
 0x2bc   :  { %700 = vmatpush1.bf16.msra.mxu1 %v1189_v27  ;;  %731 = vmatprep.mubr.bf16.mxu1 %v1237_v1  ;;  %v1198_v1 = vld [vmem:[%s1597_s9 + $0x30] ss:$8 sps:$4 sm:$0xff]  }
 0x2bd   :  { %701 = vmatprep.subr.bf16.mxu1 %v1194_v29 }
 0x2c0   :  { %702 = vmatpush1.bf16.msra.mxu1 %v1192_v30 }
 0x2c1   :  { %703 = vmatprep.subr.bf16.mxu1 %v1197_v31 }
 0x2c4   :  { %704 = vmatpush1.bf16.msra.mxu1 %v1195_v32 }
 0x2c5   :  { %705 = vmatprep.subr.bf16.mxu1 %v1200_v33 }
 0x2c8   :  { %706 = vmatpush1.bf16.msra.mxu1 %v1198_v1 }
 0x2c9   :  { %707 = vmatprep.subr.bf16.mxu1 %v1203_v34 }
 0x2cc   :  { %708 = vmatpush1.bf16.msra.mxu1 %v1201_v35 }
 0x2cd   :  { %709 = vmatprep.subr.bf16.mxu1 %v1206_v36 }
 0x2d0   :  { %710 = vmatpush1.bf16.msra.mxu1 %v1204_v37 }
 0x2d1   :  { %711 = vmatprep.subr.bf16.mxu1 %v1209_v38 }
 0x2d4   :  { %712 = vmatpush1.bf16.msra.mxu1 %v1207_v39 }
 0x2d5   :  { %713 = vmatprep.subr.bf16.mxu1 %v1212_v40 }
 0x2d8   :  { %714 = vmatpush1.bf16.msra.mxu1 %v1210_v43 }
 0x38e   :  { %v581_v57 = vpop.f32.mrb[4].mxu1 }
 0x38f   :  { %v582_v58 = vadd.f32 %v993_v56, %v581_v57  ;;  %v1131_v59 = vpop.f32.mrb[5].mxu1 }
 0x390   :  { %v584_v60 = vpop.f32.mrb[6].mxu1 }
 0x391   :  { %v585_v61 = vadd.f32 %v993_v56, %v584_v60  ;;  %v1132_v62 = vpop.f32.mrb[7].mxu1  ;;  %v588_v63 = vmax.f32 %v582_v58, 0.0 }
 0x393   :  { %v589_v0 = vmax.f32 %v585_v61, 0.0 }
 0x395   :  { %v590_v2 = vpack.c.bf16 %v589_v0, %v588_v63 }
 0x397   :  { %732 = vmatmul.mubr.bf16.vlgmr.msra.gmra.mrb[8].mxu1 %v590_v2 }
 0x46a   :  { %v733_v11 = vpop.f32.mrb[8].mxu1 }
 0x46b   :  { %v734_v12 = vadd.f32 %v733_v11, %v612_v9  ;;  %v735_v13 = vpop.f32.mrb[9].mxu1 }
 0x46c   :  { %v736_v14 = vadd.f32 %v735_v13, %v616_v10  ;;  %v737_v15 = vpop.f32.mrb[10].mxu1 }
 0x46d   :  { %v738_v16 = vadd.f32 %v737_v15, %v612_v9  ;;  %v739_v17 = vpop.f32.mrb[11].mxu1  ;;  %v742_v19 = vmax.f32 %v734_v12, 0.0 }
 0x46e   :  { %v740_v18 = vadd.f32 %v739_v17, %v616_v10  ;;  %v743_v21 = vmax.f32 %v736_v14, 0.0 }
 0x46f   :  { %v744_v20 = vmax.f32 %v738_v16, 0.0 }
 0x470   :  { %v745_v22 = vmax.f32 %v740_v18, 0.0 }
 0x471   :  { %v746_v23 = vpack.c.bf16 %v744_v20, %v742_v19 }
 0x472   :  { %v747_v24 = vpack.c.bf16 %v745_v22, %v743_v21 }
 0x474   :  { %915 = vmatprep.mubr.bf16.mxu0 %v747_v24 }
 0x475   :  { %916 = vmatmul.mubr.bf16.vlgmr.msra.gmra.mrb[8].mxu0 %v746_v23 }
 0x548   :  { %v1095_v42 = vpop.f32.mrb[8].mxu0 }
 0x549   :  { %v1096_v44 = vpop.f32.mrb[9].mxu0 }
 0x54a   :  { %v1097_v25 = vadd.f32 %v1096_v44, %v1095_v42  ;;  %v1098_v26 = vpop.f32.mrb[10].mxu0 }
 0x54b   :  { %v1099_v27 = vpop.f32.mrb[11].mxu0 }
 0x54c   :  { %v918_v28 = vadd.f32 %v1097_v25, %v1015_v41  ;;  %v1100_v29 = vadd.f32 %v1099_v27, %v1098_v26 }
 0x54e   :  { %v1032_v30 = vmul.f32 -1.442695, %v918_v28  ;;  %v921_v31 = vadd.f32 %v1100_v29, %v1015_v41 }
 0x550   :  { %1229 = vpow2.f32 %v1032_v30  ;;  %v1033_v32 = vmul.f32 -1.442695, %v921_v31 }
 0x552   :  { %1231 = vpow2.f32 %v1033_v32 }
 0x55a   :  { %v1230_v33 = vpop.eup %1229 }
 0x55b   :  { %v930_v1 = vadd.f32 1.0, %v1230_v33 }
 0x55c   :  { %v1232_v34 = vpop.eup %1231 }
 0x55d   :  { %v931_v35 = vadd.f32 1.0, %v1232_v34  ;;  %1233 = vrcp.f32 %v930_v1 }
 0x55f   :  { %1235 = vrcp.f32 %v931_v35 }
 0x567   :  { %v1234_v36 = vpop.eup %1233 }
 0x569   :  { %v1236_v37 = vpop.eup %1235 }
 0x56a   :  { %v1041_v38 = vpack.c.bf16 %v1236_v37, %v1234_v36 }
 0x56c   :  { %1042 = vst [vmem:[%s1603_s13] sm:$0xff] %v1041_v38  }

</bundles_post_ra>
